<compile_context>
chip_gen: v7x
topology: tpu7x:2x2x1
jax: 0.10.0
libtpu: 0.0.40
codegen_flags: <defaults>
</compile_context>

<pallas_src>
import functools
import math

import jax
import jax.numpy as jnp
import numpy as np
from jax import lax
from jax.experimental import pallas as pl
from jax.experimental.pallas import tpu as pltpu


def _autocorr_kernel(cos_ref, sin_ref, q_ref, k_ref, v_ref, o_ref,
                     *, L, HE, HD, top_k):
    # ---- phase 1: period-based dependency discovery (DFT as MXU matmuls) ----
    C = cos_ref[...]                      # (L, L) float32, symmetric
    S = sin_ref[...]                      # (L, L) float32, symmetric
    q = q_ref[0]                          # (L, HE) native dtype
    k = k_ref[0]                          # (L, HE)
    v = v_ref[0]                          # (L, HD)

    dot = functools.partial(jnp.dot, preferred_element_type=jnp.float32)

    # Q[f] = qc - i*qs ; conj(K[f]) = kc + i*ks      (real DFT over time axis)
    qc, qs = dot(C, q), dot(S, q)         # (L, HE) f32
    kc, ks = dot(C, k), dot(S, k)

    # cross-spectrum Q * conj(K), summed over the (head, channel) lanes
    re = jnp.sum(qc * kc + qs * ks, axis=1, keepdims=True)    # (L, 1)
    im = jnp.sum(qc * ks - qs * kc, axis=1, keepdims=True)    # (L, 1)

    # inverse DFT: corr[n] = (1/L) * sum_f (re[f]*cos - im[f]*sin)(2*pi*f*n/L)
    # mean over heads/channels adds the 1/(H*E) factor.
    scale = 1.0 / (float(L) * float(HE))
    mv = jnp.sum(re * C - im * S, axis=0, keepdims=True) * scale   # (1, L)

    # ---- top-k delays via iterative argmax (top_k is small: O(factor*lnL)) --
    n_iota = lax.broadcasted_iota(jnp.int32, (1, L), 1)
    work = mv
    weights, delays = [], []
    for _ in range(top_k):
        w_i = jnp.max(work)
        d_i = jnp.min(jnp.where(work == w_i, n_iota, L)).astype(jnp.int32)
        weights.append(w_i)
        delays.append(d_i)
        work = jnp.where(n_iota == d_i, jnp.float32(-jnp.inf), work)

    # softmax over the top_k scalar weights
    m = weights[0]
    for w in weights[1:]:
        m = jnp.maximum(m, w)
    exps = [jnp.exp(w - m) for w in weights]
    denom = exps[0]
    for e in exps[1:]:
        denom = denom + e
    probs = [e / denom for e in exps]

    # ---- phase 2: time-delay aggregation as one circulant matmul ------------
    # out[t, :] = sum_i prob_i * v[(t + delay_i) mod L, :]  ==  (W @ v)[t, :]
    # with W[t, s] = sum_i prob_i * [(s - t) mod L == delay_i]
    tt = lax.broadcasted_iota(jnp.int32, (L, L), 0)
    ss = lax.broadcasted_iota(jnp.int32, (L, L), 1)
    diff = ss - tt
    dmat = jnp.where(diff < 0, diff + L, diff)        # (s - t) mod L, branchless
    W = jnp.zeros((L, L), jnp.float32)
    for i in range(top_k):
        W = W + jnp.where(dmat == delays[i], probs[i], jnp.float32(0.0))

    o_ref[0] = dot(W, v).astype(o_ref.dtype)


def autocorrelation_forward(queries, keys, values, *, factor):
    """queries: (B, L, H, E); keys: (B, S, H, E); values: (B, S, H, D)."""
    B, L, H, E = queries.shape
    _, S, _, D = values.shape

    # length alignment (same as torch forward)
    if L > S:
        values = jnp.concatenate(
            [values, jnp.zeros((B, L - S, H, D), values.dtype)], axis=1)
        keys = jnp.concatenate(
            [keys, jnp.zeros((B, L - S, H, E), keys.dtype)], axis=1)
    else:
        values = values[:, :L]
        keys = keys[:, :L]

    top_k = int(factor * math.log(L))
    top_k = max(1, min(top_k, L))         # clamp (review correctness concern)
    HE, HD = H * E, H * D

    # Host-precomputed DFT twiddle matrices.  Angles reduced mod 2*pi exactly
    # via integer (f*t) mod L, so they stay accurate at any L (int32 is fine
    # for Autoformer-scale L).  These are shared across the whole batch.
    idx = jnp.arange(L, dtype=jnp.int32)
    ft = (idx[:, None] * idx[None, :]) % L
    ang = (2.0 * np.pi / L) * ft.astype(jnp.float32)
    cos_m = jnp.cos(ang)                  # (L, L), symmetric
    sin_m = jnp.sin(ang)

    # No dtype cast here (review item): pass native dtype, promote in-kernel.
    q_r = queries.reshape(B, L, HE)
    k_r = keys.reshape(B, L, HE)
    v_r = values.reshape(B, L, HD)

    kernel = functools.partial(_autocorr_kernel, L=L, HE=HE, HD=HD, top_k=top_k)
    out = pl.pallas_call(
        kernel,
        out_shape=jax.ShapeDtypeStruct((B, L, HD), jnp.float32),
        grid_spec=pltpu.PrefetchScalarGridSpec(
            num_scalar_prefetch=0,
            grid=(B,),
            in_specs=[
                pl.BlockSpec((L, L), lambda b: (0, 0)),        # cos twiddles
                pl.BlockSpec((L, L), lambda b: (0, 0)),        # sin twiddles
                pl.BlockSpec((1, L, HE), lambda b: (b, 0, 0)),  # queries
                pl.BlockSpec((1, L, HE), lambda b: (b, 0, 0)),  # keys
                pl.BlockSpec((1, L, HD), lambda b: (b, 0, 0)),  # values
            ],
            out_specs=pl.BlockSpec((1, L, HD), lambda b: (b, 0, 0)),
        ),
        compiler_params=pltpu.CompilerParams(
            dimension_semantics=("parallel",),      # megacore over batch
            vmem_limit_bytes=32 * 1024 * 1024,      # raise v5e's 16 MiB default
        ),
    )(cos_m, sin_m, q_r, k_r, v_r)
    return out.reshape(B, L, H, D)


def reference_forward(queries, keys, values, *, factor):
    """Pure-JAX mirror of the PyTorch eval-mode forward (FFT-based)."""
    B, L, H, E = queries.shape
    _, S, _, D = values.shape
    if L > S:
        values = jnp.concatenate(
            [values, jnp.zeros((B, L - S, H, D), values.dtype)], axis=1)
        keys = jnp.concatenate(
            [keys, jnp.zeros((B, L - S, H, E), keys.dtype)], axis=1)
    else:
        values = values[:, :L]
        keys = keys[:, :L]

    qp = jnp.transpose(queries, (0, 2, 3, 1))
    kp = jnp.transpose(keys, (0, 2, 3, 1))
    vp = jnp.transpose(values, (0, 2, 3, 1))
    corr = jnp.fft.irfft(jnp.fft.rfft(qp, axis=-1) *
                         jnp.conj(jnp.fft.rfft(kp, axis=-1)), n=L, axis=-1)
    mean_value = jnp.mean(jnp.mean(corr, axis=1), axis=1)          # (B, L)
    top_k = int(factor * math.log(L))
    top_k = max(1, min(top_k, L))
    weights, delay = lax.top_k(mean_value, top_k)
    tmp_corr = jax.nn.softmax(weights, axis=-1)

    init_index = jnp.arange(L)
    agg = jnp.zeros_like(vp, dtype=jnp.float32)
    for i in range(top_k):
        idx = (init_index[None, None, None, :] +
               delay[:, i][:, None, None, None]) % L
        idx = jnp.broadcast_to(idx, vp.shape)
        pattern = jnp.take_along_axis(vp, idx, axis=-1)
        agg = agg + pattern * tmp_corr[:, i][:, None, None, None]
    return jnp.transpose(agg, (0, 3, 1, 2))                        # (B, L, H, D)


if __name__ == "__main__":
    # small shapes consistent with the module: B, L(=S), H heads, E=D head dim
    B, L, S, H, E, D = 2, 16, 16, 2, 8, 8
    factor = 2   # args.factor ; top_k = int(2 * ln(16)) = 5

    key = jax.random.PRNGKey(0)
    kq, kk, kv = jax.random.split(key, 3)
    queries = jax.random.normal(kq, (B, L, H, E), jnp.float32)
    keys = jax.random.normal(kk, (B, S, H, E), jnp.float32)
    values = jax.random.normal(kv, (B, S, H, D), jnp.float32)

    out = autocorrelation_forward(queries, keys, values, factor=factor)
    out = jax.block_until_ready(out)

    ref = reference_forward(queries, keys, values, factor=factor)
    if not np.allclose(np.asarray(out), np.asarray(ref), rtol=1e-3, atol=1e-3):
        raise AssertionError("Pallas AutoCorrelation kernel mismatch vs reference")

    print("KERNEL_OK")
</pallas_src>

<mosaic_0001>
module attributes {stable_mosaic.version = 11 : i64} {
  func.func @_autocorr_kernel(%arg0: i32, %arg1: memref<16x16xf32, #tpu.memory_space<vmem>>, %arg2: memref<16x16xf32, #tpu.memory_space<vmem>>, %arg3: memref<1x16x16xf32, #tpu.memory_space<vmem>>, %arg4: memref<1x16x16xf32, #tpu.memory_space<vmem>>, %arg5: memref<1x16x16xf32, #tpu.memory_space<vmem>>, %arg6: memref<1x16x16xf32, #tpu.memory_space<vmem>>) attributes {dimension_semantics = [#tpu.dimension_semantics<parallel>], iteration_bounds = array<i64: 2>, scalar_prefetch = 0 : i64, scratch_operands = 0 : i64, tpu.core_type = #tpu.core_type<tc>, window_params = [{pipeline_mode = #tpu.pipeline_mode<synchronous>, transform_indices = @transform_0, window_bounds = array<i64: 16, 16>}, {pipeline_mode = #tpu.pipeline_mode<synchronous>, transform_indices = @transform_1, window_bounds = array<i64: 16, 16>}, {transform_indices = @transform_2, window_bounds = array<i64: 1, 16, 16>}, {transform_indices = @transform_3, window_bounds = array<i64: 1, 16, 16>}, {transform_indices = @transform_4, window_bounds = array<i64: 1, 16, 16>}, {transform_indices = @transform_5, window_bounds = array<i64: 1, 16, 16>}]} {
    %c0 = arith.constant 0 : index
    %c0_0 = arith.constant 0 : index
    %0 = vector.load %arg1[%c0, %c0_0] : memref<16x16xf32, #tpu.memory_space<vmem>>, vector<16x16xf32>
    %c0_1 = arith.constant 0 : index
    %c0_2 = arith.constant 0 : index
    %1 = vector.load %arg2[%c0_1, %c0_2] : memref<16x16xf32, #tpu.memory_space<vmem>>, vector<16x16xf32>
    %c0_3 = arith.constant 0 : index
    %c0_4 = arith.constant 0 : index
    %c0_5 = arith.constant 0 : index
    %2 = vector.load %arg3[%c0_3, %c0_4, %c0_5] : memref<1x16x16xf32, #tpu.memory_space<vmem>>, vector<1x16x16xf32>
    %3 = vector.shape_cast %2 : vector<1x16x16xf32> to vector<16x16xf32>
    %c0_6 = arith.constant 0 : index
    %c0_7 = arith.constant 0 : index
    %c0_8 = arith.constant 0 : index
    %4 = vector.load %arg4[%c0_6, %c0_7, %c0_8] : memref<1x16x16xf32, #tpu.memory_space<vmem>>, vector<1x16x16xf32>
    %5 = vector.shape_cast %4 : vector<1x16x16xf32> to vector<16x16xf32>
    %c0_9 = arith.constant 0 : index
    %c0_10 = arith.constant 0 : index
    %c0_11 = arith.constant 0 : index
    %6 = vector.load %arg5[%c0_9, %c0_10, %c0_11] : memref<1x16x16xf32, #tpu.memory_space<vmem>>, vector<1x16x16xf32>
    %7 = vector.shape_cast %6 : vector<1x16x16xf32> to vector<16x16xf32>
    %cst = arith.constant dense<0.000000e+00> : vector<16x16xf32>
    %8 = tpu.matmul %0, %3, %cst {dimension_numbers = #tpu.dot_dimension_numbers<[1], [0], [0], [1], [0, 0, 1, 1], [], []>} : vector<16x16xf32>, vector<16x16xf32>, vector<16x16xf32> -> vector<16x16xf32>
    %cst_12 = arith.constant dense<0.000000e+00> : vector<16x16xf32>
    %9 = tpu.matmul %1, %3, %cst_12 {dimension_numbers = #tpu.dot_dimension_numbers<[1], [0], [0], [1], [0, 0, 1, 1], [], []>} : vector<16x16xf32>, vector<16x16xf32>, vector<16x16xf32> -> vector<16x16xf32>
    %cst_13 = arith.constant dense<0.000000e+00> : vector<16x16xf32>
    %10 = tpu.matmul %0, %5, %cst_13 {dimension_numbers = #tpu.dot_dimension_numbers<[1], [0], [0], [1], [0, 0, 1, 1], [], []>} : vector<16x16xf32>, vector<16x16xf32>, vector<16x16xf32> -> vector<16x16xf32>
    %cst_14 = arith.constant dense<0.000000e+00> : vector<16x16xf32>
    %11 = tpu.matmul %1, %5, %cst_14 {dimension_numbers = #tpu.dot_dimension_numbers<[1], [0], [0], [1], [0, 0, 1, 1], [], []>} : vector<16x16xf32>, vector<16x16xf32>, vector<16x16xf32> -> vector<16x16xf32>
    %12 = arith.mulf %8, %10 : vector<16x16xf32>
    %13 = arith.mulf %9, %11 : vector<16x16xf32>
    %14 = arith.addf %12, %13 : vector<16x16xf32>
    %cst_15 = arith.constant dense<0.000000e+00> : vector<16xf32>
    %15 = vector.multi_reduction <add>, %14, %cst_15 [1] : vector<16x16xf32> to vector<16xf32>
    %16 = vector.shape_cast %15 : vector<16xf32> to vector<16x1xf32>
    %17 = arith.mulf %8, %11 : vector<16x16xf32>
    %18 = arith.mulf %9, %10 : vector<16x16xf32>
    %19 = arith.subf %17, %18 : vector<16x16xf32>
    %cst_16 = arith.constant dense<0.000000e+00> : vector<16xf32>
    %20 = vector.multi_reduction <add>, %19, %cst_16 [1] : vector<16x16xf32> to vector<16xf32>
    %21 = vector.shape_cast %20 : vector<16xf32> to vector<16x1xf32>
    %22 = vector.broadcast %16 : vector<16x1xf32> to vector<16x16xf32>
    %23 = arith.mulf %22, %0 : vector<16x16xf32>
    %24 = vector.broadcast %21 : vector<16x1xf32> to vector<16x16xf32>
    %25 = arith.mulf %24, %1 : vector<16x16xf32>
    %26 = arith.subf %23, %25 : vector<16x16xf32>
    %cst_17 = arith.constant dense<0.000000e+00> : vector<16xf32>
    %27 = vector.multi_reduction <add>, %26, %cst_17 [0] : vector<16x16xf32> to vector<16xf32>
    %28 = vector.shape_cast %27 : vector<16xf32> to vector<1x16xf32>
    %cst_18 = arith.constant 3.906250e-03 : f32
    %29 = vector.broadcast %cst_18 : f32 to vector<1x16xf32>
    %30 = arith.mulf %28, %29 : vector<1x16xf32>
    %31 = tpu.iota {dimensions = array<i32: 1>} : vector<1x16xi32>
    %32 = vector.shape_cast %30 : vector<1x16xf32> to vector<1x1x16xf32>
    %cst_19 = arith.constant dense<0xFF800000> : vector<1xf32>
    %33 = vector.multi_reduction <maximumf>, %32, %cst_19 [1, 2] : vector<1x1x16xf32> to vector<1xf32>
    %34 = vector.shape_cast %33 : vector<1xf32> to vector<1x1x1xf32>
    %35 = vector.extract %34[0, 0, 0] : f32 from vector<1x1x1xf32>
    %36 = vector.broadcast %35 : f32 to vector<1x16xf32>
    %37 = arith.cmpf oeq, %30, %36 : vector<1x16xf32>
    %c16_i32 = arith.constant 16 : i32
    %38 = vector.broadcast %c16_i32 : i32 to vector<1x16xi32>
    %39 = arith.select %37, %31, %38 : vector<1x16xi1>, vector<1x16xi32>
    %40 = vector.shape_cast %39 : vector<1x16xi32> to vector<1x1x16xi32>
    %cst_20 = arith.constant dense<2147483647> : vector<1xi32>
    %41 = vector.multi_reduction <minsi>, %40, %cst_20 [1, 2] : vector<1x1x16xi32> to vector<1xi32>
    %42 = vector.shape_cast %41 : vector<1xi32> to vector<1x1x1xi32>
    %43 = vector.extract %42[0, 0, 0] : i32 from vector<1x1x1xi32>
    %44 = vector.broadcast %43 : i32 to vector<1x16xi32>
    %45 = arith.cmpi eq, %31, %44 : vector<1x16xi32>
    %cst_21 = arith.constant 0xFF800000 : f32
    %46 = vector.broadcast %cst_21 : f32 to vector<1x16xf32>
    %47 = arith.select %45, %46, %30 : vector<1x16xi1>, vector<1x16xf32>
    %48 = vector.shape_cast %47 : vector<1x16xf32> to vector<1x1x16xf32>
    %cst_22 = arith.constant dense<0xFF800000> : vector<1xf32>
    %49 = vector.multi_reduction <maximumf>, %48, %cst_22 [1, 2] : vector<1x1x16xf32> to vector<1xf32>
    %50 = vector.shape_cast %49 : vector<1xf32> to vector<1x1x1xf32>
    %51 = vector.extract %50[0, 0, 0] : f32 from vector<1x1x1xf32>
    %52 = vector.broadcast %51 : f32 to vector<1x16xf32>
    %53 = arith.cmpf oeq, %47, %52 : vector<1x16xf32>
    %c16_i32_23 = arith.constant 16 : i32
    %54 = vector.broadcast %c16_i32_23 : i32 to vector<1x16xi32>
    %55 = arith.select %53, %31, %54 : vector<1x16xi1>, vector<1x16xi32>
    %56 = vector.shape_cast %55 : vector<1x16xi32> to vector<1x1x16xi32>
    %cst_24 = arith.constant dense<2147483647> : vector<1xi32>
    %57 = vector.multi_reduction <minsi>, %56, %cst_24 [1, 2] : vector<1x1x16xi32> to vector<1xi32>
    %58 = vector.shape_cast %57 : vector<1xi32> to vector<1x1x1xi32>
    %59 = vector.extract %58[0, 0, 0] : i32 from vector<1x1x1xi32>
    %60 = vector.broadcast %59 : i32 to vector<1x16xi32>
    %61 = arith.cmpi eq, %31, %60 : vector<1x16xi32>
    %cst_25 = arith.constant 0xFF800000 : f32
    %62 = vector.broadcast %cst_25 : f32 to vector<1x16xf32>
    %63 = arith.select %61, %62, %47 : vector<1x16xi1>, vector<1x16xf32>
    %64 = vector.shape_cast %63 : vector<1x16xf32> to vector<1x1x16xf32>
    %cst_26 = arith.constant dense<0xFF800000> : vector<1xf32>
    %65 = vector.multi_reduction <maximumf>, %64, %cst_26 [1, 2] : vector<1x1x16xf32> to vector<1xf32>
    %66 = vector.shape_cast %65 : vector<1xf32> to vector<1x1x1xf32>
    %67 = vector.extract %66[0, 0, 0] : f32 from vector<1x1x1xf32>
    %68 = vector.broadcast %67 : f32 to vector<1x16xf32>
    %69 = arith.cmpf oeq, %63, %68 : vector<1x16xf32>
    %c16_i32_27 = arith.constant 16 : i32
    %70 = vector.broadcast %c16_i32_27 : i32 to vector<1x16xi32>
    %71 = arith.select %69, %31, %70 : vector<1x16xi1>, vector<1x16xi32>
    %72 = vector.shape_cast %71 : vector<1x16xi32> to vector<1x1x16xi32>
    %cst_28 = arith.constant dense<2147483647> : vector<1xi32>
    %73 = vector.multi_reduction <minsi>, %72, %cst_28 [1, 2] : vector<1x1x16xi32> to vector<1xi32>
    %74 = vector.shape_cast %73 : vector<1xi32> to vector<1x1x1xi32>
    %75 = vector.extract %74[0, 0, 0] : i32 from vector<1x1x1xi32>
    %76 = vector.broadcast %75 : i32 to vector<1x16xi32>
    %77 = arith.cmpi eq, %31, %76 : vector<1x16xi32>
    %cst_29 = arith.constant 0xFF800000 : f32
    %78 = vector.broadcast %cst_29 : f32 to vector<1x16xf32>
    %79 = arith.select %77, %78, %63 : vector<1x16xi1>, vector<1x16xf32>
    %80 = vector.shape_cast %79 : vector<1x16xf32> to vector<1x1x16xf32>
    %cst_30 = arith.constant dense<0xFF800000> : vector<1xf32>
    %81 = vector.multi_reduction <maximumf>, %80, %cst_30 [1, 2] : vector<1x1x16xf32> to vector<1xf32>
    %82 = vector.shape_cast %81 : vector<1xf32> to vector<1x1x1xf32>
    %83 = vector.extract %82[0, 0, 0] : f32 from vector<1x1x1xf32>
    %84 = vector.broadcast %83 : f32 to vector<1x16xf32>
    %85 = arith.cmpf oeq, %79, %84 : vector<1x16xf32>
    %c16_i32_31 = arith.constant 16 : i32
    %86 = vector.broadcast %c16_i32_31 : i32 to vector<1x16xi32>
    %87 = arith.select %85, %31, %86 : vector<1x16xi1>, vector<1x16xi32>
    %88 = vector.shape_cast %87 : vector<1x16xi32> to vector<1x1x16xi32>
    %cst_32 = arith.constant dense<2147483647> : vector<1xi32>
    %89 = vector.multi_reduction <minsi>, %88, %cst_32 [1, 2] : vector<1x1x16xi32> to vector<1xi32>
    %90 = vector.shape_cast %89 : vector<1xi32> to vector<1x1x1xi32>
    %91 = vector.extract %90[0, 0, 0] : i32 from vector<1x1x1xi32>
    %92 = vector.broadcast %91 : i32 to vector<1x16xi32>
    %93 = arith.cmpi eq, %31, %92 : vector<1x16xi32>
    %cst_33 = arith.constant 0xFF800000 : f32
    %94 = vector.broadcast %cst_33 : f32 to vector<1x16xf32>
    %95 = arith.select %93, %94, %79 : vector<1x16xi1>, vector<1x16xf32>
    %96 = vector.shape_cast %95 : vector<1x16xf32> to vector<1x1x16xf32>
    %cst_34 = arith.constant dense<0xFF800000> : vector<1xf32>
    %97 = vector.multi_reduction <maximumf>, %96, %cst_34 [1, 2] : vector<1x1x16xf32> to vector<1xf32>
    %98 = vector.shape_cast %97 : vector<1xf32> to vector<1x1x1xf32>
    %99 = vector.extract %98[0, 0, 0] : f32 from vector<1x1x1xf32>
    %100 = vector.broadcast %99 : f32 to vector<1x16xf32>
    %101 = arith.cmpf oeq, %95, %100 : vector<1x16xf32>
    %c16_i32_35 = arith.constant 16 : i32
    %102 = vector.broadcast %c16_i32_35 : i32 to vector<1x16xi32>
    %103 = arith.select %101, %31, %102 : vector<1x16xi1>, vector<1x16xi32>
    %104 = vector.shape_cast %103 : vector<1x16xi32> to vector<1x1x16xi32>
    %cst_36 = arith.constant dense<2147483647> : vector<1xi32>
    %105 = vector.multi_reduction <minsi>, %104, %cst_36 [1, 2] : vector<1x1x16xi32> to vector<1xi32>
    %106 = vector.shape_cast %105 : vector<1xi32> to vector<1x1x1xi32>
    %107 = vector.extract %106[0, 0, 0] : i32 from vector<1x1x1xi32>
    %108 = arith.maximumf %35, %51 : f32
    %109 = arith.maximumf %108, %67 : f32
    %110 = arith.maximumf %109, %83 : f32
    %111 = arith.maximumf %110, %99 : f32
    %112 = arith.subf %35, %111 : f32
    %113 = math.exp %112 : f32
    %114 = arith.subf %51, %111 : f32
    %115 = math.exp %114 : f32
    %116 = arith.subf %67, %111 : f32
    %117 = math.exp %116 : f32
    %118 = arith.subf %83, %111 : f32
    %119 = math.exp %118 : f32
    %120 = arith.subf %99, %111 : f32
    %121 = math.exp %120 : f32
    %122 = arith.addf %113, %115 : f32
    %123 = arith.addf %122, %117 : f32
    %124 = arith.addf %123, %119 : f32
    %125 = arith.addf %124, %121 : f32
    %126 = arith.divf %113, %125 : f32
    %127 = arith.divf %115, %125 : f32
    %128 = arith.divf %117, %125 : f32
    %129 = arith.divf %119, %125 : f32
    %130 = arith.divf %121, %125 : f32
    %131 = tpu.iota {dimensions = array<i32: 0>} : vector<16x16xi32>
    %132 = tpu.iota {dimensions = array<i32: 1>} : vector<16x16xi32>
    %133 = arith.subi %132, %131 : vector<16x16xi32>
    %c0_i32 = arith.constant 0 : i32
    %134 = vector.broadcast %c0_i32 : i32 to vector<16x16xi32>
    %135 = arith.cmpi slt, %133, %134 : vector<16x16xi32>
    %c16_i32_37 = arith.constant 16 : i32
    %136 = vector.broadcast %c16_i32_37 : i32 to vector<16x16xi32>
    %137 = arith.addi %133, %136 : vector<16x16xi32>
    %138 = arith.select %135, %137, %133 : vector<16x16xi1>, vector<16x16xi32>
    %cst_38 = arith.constant 0.000000e+00 : f32
    %139 = vector.broadcast %cst_38 : f32 to vector<16x16xf32>
    %140 = vector.broadcast %43 : i32 to vector<16x16xi32>
    %141 = arith.cmpi eq, %138, %140 : vector<16x16xi32>
    %cst_39 = arith.constant 0.000000e+00 : f32
    %142 = vector.broadcast %126 : f32 to vector<16x16xf32>
    %143 = vector.broadcast %cst_39 : f32 to vector<16x16xf32>
    %144 = arith.select %141, %142, %143 : vector<16x16xi1>, vector<16x16xf32>
    %145 = arith.addf %139, %144 : vector<16x16xf32>
    %146 = vector.broadcast %59 : i32 to vector<16x16xi32>
    %147 = arith.cmpi eq, %138, %146 : vector<16x16xi32>
    %cst_40 = arith.constant 0.000000e+00 : f32
    %148 = vector.broadcast %127 : f32 to vector<16x16xf32>
    %149 = vector.broadcast %cst_40 : f32 to vector<16x16xf32>
    %150 = arith.select %147, %148, %149 : vector<16x16xi1>, vector<16x16xf32>
    %151 = arith.addf %145, %150 : vector<16x16xf32>
    %152 = vector.broadcast %75 : i32 to vector<16x16xi32>
    %153 = arith.cmpi eq, %138, %152 : vector<16x16xi32>
    %cst_41 = arith.constant 0.000000e+00 : f32
    %154 = vector.broadcast %128 : f32 to vector<16x16xf32>
    %155 = vector.broadcast %cst_41 : f32 to vector<16x16xf32>
    %156 = arith.select %153, %154, %155 : vector<16x16xi1>, vector<16x16xf32>
    %157 = arith.addf %151, %156 : vector<16x16xf32>
    %158 = vector.broadcast %91 : i32 to vector<16x16xi32>
    %159 = arith.cmpi eq, %138, %158 : vector<16x16xi32>
    %cst_42 = arith.constant 0.000000e+00 : f32
    %160 = vector.broadcast %129 : f32 to vector<16x16xf32>
    %161 = vector.broadcast %cst_42 : f32 to vector<16x16xf32>
    %162 = arith.select %159, %160, %161 : vector<16x16xi1>, vector<16x16xf32>
    %163 = arith.addf %157, %162 : vector<16x16xf32>
    %164 = vector.broadcast %107 : i32 to vector<16x16xi32>
    %165 = arith.cmpi eq, %138, %164 : vector<16x16xi32>
    %cst_43 = arith.constant 0.000000e+00 : f32
    %166 = vector.broadcast %130 : f32 to vector<16x16xf32>
    %167 = vector.broadcast %cst_43 : f32 to vector<16x16xf32>
    %168 = arith.select %165, %166, %167 : vector<16x16xi1>, vector<16x16xf32>
    %169 = arith.addf %163, %168 : vector<16x16xf32>
    %cst_44 = arith.constant dense<0.000000e+00> : vector<16x16xf32>
    %170 = tpu.matmul %169, %7, %cst_44 {dimension_numbers = #tpu.dot_dimension_numbers<[1], [0], [0], [1], [0, 0, 1, 1], [], []>} : vector<16x16xf32>, vector<16x16xf32>, vector<16x16xf32> -> vector<16x16xf32>
    %c0_45 = arith.constant 0 : index
    %c0_46 = arith.constant 0 : index
    %c0_47 = arith.constant 0 : index
    %171 = vector.load %arg6[%c0_45, %c0_46, %c0_47] : memref<1x16x16xf32, #tpu.memory_space<vmem>>, vector<1x16x16xf32>
    %172 = vector.shape_cast %171 : vector<1x16x16xf32> to vector<16x16xf32>
    %173 = vector.shape_cast %170 : vector<16x16xf32> to vector<1x16x16xf32>
    tpu.vector_store %arg6[%c0_45, %c0_46, %c0_47], %173 {strides = array<i32>} : memref<1x16x16xf32, #tpu.memory_space<vmem>>, vector<1x16x16xf32>,
    return
  }
  func.func @transform_0(%arg0: i32) -> (i32, i32) {
    %c0_i32 = arith.constant 0 : i32
    %c0_i32_0 = arith.constant 0 : i32
    %c0_i32_1 = arith.constant 0 : i32
    return %c0_i32, %c0_i32_0 : i32, i32
  }
  func.func @transform_1(%arg0: i32) -> (i32, i32) {
    %c0_i32 = arith.constant 0 : i32
    %c0_i32_0 = arith.constant 0 : i32
    %c0_i32_1 = arith.constant 0 : i32
    return %c0_i32, %c0_i32_0 : i32, i32
  }
  func.func @transform_2(%arg0: i32) -> (i32, i32, i32) {
    %c0_i32 = arith.constant 0 : i32
    %c0_i32_0 = arith.constant 0 : i32
    %c0_i32_1 = arith.constant 0 : i32
    return %arg0, %c0_i32, %c0_i32_0 : i32, i32, i32
  }
  func.func @transform_3(%arg0: i32) -> (i32, i32, i32) {
    %c0_i32 = arith.constant 0 : i32
    %c0_i32_0 = arith.constant 0 : i32
    %c0_i32_1 = arith.constant 0 : i32
    return %arg0, %c0_i32, %c0_i32_0 : i32, i32, i32
  }
  func.func @transform_4(%arg0: i32) -> (i32, i32, i32) {
    %c0_i32 = arith.constant 0 : i32
    %c0_i32_0 = arith.constant 0 : i32
    %c0_i32_1 = arith.constant 0 : i32
    return %arg0, %c0_i32, %c0_i32_0 : i32, i32, i32
  }
  func.func @transform_5(%arg0: i32) -> (i32, i32, i32) {
    %c0_i32 = arith.constant 0 : i32
    %c0_i32_0 = arith.constant 0 : i32
    %c0_i32_1 = arith.constant 0 : i32
    return %arg0, %c0_i32, %c0_i32_0 : i32, i32, i32
  }
}

</mosaic_0001>

<bundles_post_ra>
// kernel: tpu_custom_call.1
= control target key start
LH: loop header
LB: loop body
LE: loop exit
PB: predicated region body
PF: predicated region fallthrough
CT: control target
= control target key end

     0   :  { %s2108_s0 = inlined_call_operand.hbm [shape: f32[16,16], index: 0, kind: input, shape index: {}]   ;;  %s2109_s1 = inlined_call_operand.hbm [shape: f32[16,16], index: 1, kind: input, shape index: {}]   ;;  %s2110_s2 = inlined_call_operand.hbm [shape: f32[2,16,16], index: 2, kind: input, shape index: {}]   ;;  %s2111_s3 = inlined_call_operand.hbm [shape: f32[2,16,16], index: 3, kind: input, shape index: {}]   ;;  %s2112_s4 = inlined_call_operand.hbm [shape: f32[2,16,16], index: 4, kind: input, shape index: {}]   ;;  %s2113_s5 = inlined_call_operand.hbm [shape: f32[2,16,16], index: 5, kind: output, shape index: {}]  }
   0x1   :  { %2131 = sst [smem:[#allocation18_spill]] %s2108_s0 }
   0x2   :  { %2132 = sst [smem:[#allocation19_spill]] %s2110_s2 }
   0x3   :  { %2133 = sst [smem:[#allocation20_spill]] %s2111_s3 }
   0x4   :  { %10 = vsyncpa [#allocation3], 0 }
   0x5   :  { %11 = vsyncpa [#allocation6], 0 }
   0x6   :  { %12 = vsyncpa [#allocation4], 0 }
   0x7   :  { %14 = vsyncpa [#allocation4 + $0x1], 0  ;;  %s1667_s18 = smov 0   ;;  %s1669_s19 = smov 0  }
   0x8   :  { %s1671_s20 = smov 0   ;;  %s1673_s21 = smov 0  }
   0x9 LB: > { %2134 = sst [smem:[#allocation15_spill]] %s1621_s20  ;;  %s1688_s22 = sadd.s32 4294967295, %s1625_s21   ;;  %s1625_s21 = sphi %s1673_s21, %s2166_s21   ;;  %s1621_s20 = sphi %s1671_s20, %s2168_s20   ;;  %s1617_s19 = sphi %s1669_s19, %s2170_s19   ;;  %s1613_s18 = sphi %s1667_s18, %s2169_s18  }
   0xa   : > { %s1165_s23 = sadd.s32 4294967294, %s1625_s21   ;;  %s1692_s24 = sadd.s32 1, %s1625_s21  }
   0xb   : > { %2135 = sst [smem:[#allocation16_spill]] %s1692_s24  ;;  %s69_s25 = sadd.s32 1, %s1621_s20 }
   0xc   : > { %s66_s26 = ssub.s32 %s1625_s21, %s1692_s24  ;;  %p76_p0 = scmp.ne.s32.totalorder %s1621_s20, %s1617_s19 }
   0xd   : > { %p67_p1 = scmp.eq.s32.totalorder %s66_s26, 0  ;;  %p77_p2 = scmp.eq.s32.totalorder %s1625_s21, 0 }
   0xe   : > { %p82_p3 = scmp.ne.s32.totalorder %s1617_s19, %s1613_s18  ;;  %p2114_p4 = scmp.eq.s32.totalorder %s1688_s22, 0 }
   0xf   : > { %s1704_s27 = scalar_select %p67_p1, %s1621_s20, %s69_s25  }
  0x10   : > { %p1706_p5 = por %p77_p2, %p76_p0  ;;  %p1712_p6 = por %p2114_p4, %p82_p3 }
  0x11   : > { %2136 = sst [smem:[#allocation17_spill]] %s1704_s27  ;;  %p158_p7 = scmp.eq.s32.totalorder %s1688_s22, 1 }
  0x12   : > { %s2137_s28 = scalar_select %p1706_p5, 1, 0 }
  0x13   : > { %s2138_s29 = scalar_select %p1712_p6, 1, 0 }
  0x14   : > { %p164_p8 = scmp.eq.s32.totalorder %s1165_s23, 1  ;;  %p1166_p9 = scmp.ge.s32.totalorder %s1625_s21, 1 }
  0x15   : > { %p171_p10 = scmp.lt.s32.totalorder %s1625_s21, 3  ;;  %p1719_p11 = por %p158_p7, %p76_p0 }
  0x16   : > { %p1723_p12 = por %p164_p8, %p82_p3  ;;  %s1627_s8 = smov [#allocation2]  }
  0x17   : > { %s2139_s30 = scalar_select %p1719_p11, 1, 0 }
  0x18   : > { %s2140_s6 = scalar_select %p1723_p12, 1, 0 }
  0x19   : > { %p1727_p13 = pnand %p1166_p9, %p171_p10  ;;  %s183_s9 = sshll.u32 %s1627_s8, 4  ;;  %s184_s9 = int_to_ptr.vmem [resolvable:$true] %s183_s9 }
  0x1a   : > { %s210_s11 = sand.u32 1, %s1625_s21   ;;  %s2143_s0 = sld [smem:[#allocation18_spill]] }
  0x1b   : > { %s2141_s7 = scalar_select %p1727_p13, 1, 0 }
  0x1c   : > { %p1328_p1 = pneg %p1727_p13 }
  0x1e   : > { %p1735_p2 = pnand %p1328_p1, %p2114_p4 }
  0x20   : > { %s2142_s10 = scalar_select %p1735_p2, 1, 0 }
  0x21   : > { %s1405_s14 = scalar_lea.hbm %s2143_s0, 256  ;;  %p2122_p8 = pneg %p1735_p2 }
  0x22   : > { %p1406_p7 = scmp.ne.s32.totalorder %s2143_s0, %s1405_s14  ;;  %p1412_p1 = scmp.lt.u32.totalorder %s1405_s14, %s2143_s0 }
  0x24   : > { %p1408_p9 = pnand %p2122_p8, %p1406_p7 }
  0x26   : > { %p1409_p10 = pneg %p1408_p9 }
  0x28   : > { %p1414_p0 = pnand %p1412_p1, %p1409_p10 }
  0x2a   : > { %1417 = shalt.err (!%p1414_p0)
}
  0x2b   : > { %s1418_s25 = scalar_lea.vmem %s184_s9, 256  ;;  %p1426_p11 = scmp.lt.s32.totalorder %s184_s9, %s184_s9 }
  0x2c   : > { %p1419_p4 = scmp.ne.s32.totalorder %s184_s9, %s1418_s25  ;;  %p1427_p6 = scmp.lt.s32.totalorder %s1418_s25, %s1418_s25 }
  0x2e   : > { %p1421_p3 = pnand %p1419_p4, %p2122_p8  ;;  %p1428_p13 = por %p1427_p6, %p1426_p11 }
  0x30   : > { %p1422_p12 = pneg %p1421_p3 }
  0x32   : > { %p1429_p5 = pnand %p1428_p13, %p1422_p12 }
  0x34   : > { %1432 = shalt.err (!%p1429_p5)
}
  0x35   : > { %s2118_s26 = smov 128   ;;  %s2120_s8 = smov 8  }
  0x36   : > { %1331 = dma.hbm_to_vmem [thread:$0]  (!%p1735_p2), %s2143_s0, 256, %s184_s9, [#allocation3], %s2118_s26, %s2118_s26, %s2120_s8  }
  0x37   : > { %p2144_p4 = scmp.ne.s32.totalorder %s2137_s28, 0  ;;  %p2145_p0 = scmp.lt.s32.totalorder %s1625_s21, 2 }
  0x38   : > { %s212_s15 = sand.u32 1, %s1621_s20   ;;  %s1779_s17 = sshll.u32 %s1625_s21, 8 }
  0x39   : > { %p1771_p6 = pnand %p2145_p0, %p2144_p4  ;;  %s1776_s16 = sshll.u32 %s212_s15, 4 }
  0x3a   : > { %s2147_s2 = sld [smem:[#allocation19_spill]]  ;;  %s214_s28 = scalar_lea.vmem [#allocation7], %s1776_s16 }
  0x3b   : > { %s2146_s14 = scalar_select %p1771_p6, 1, 0 }
  0x3c   : > { %s221_s9 = sshll.u32 %s214_s28, 4  ;;  %s1790_s12 = scalar_lea.sflag [#allocation3], %s210_s11  ;;  %s1788_s9 = int_to_ptr.vmem [resolvable:$true] %s221_s9 }
  0x3d   : > { %p1796_p11 = pneg %p1771_p6 }
  0x3f   : > { %s2148_s15 = scalar_select %p1796_p11, 1, 0 }
  0x40   : > { %s1785_s27 = scalar_lea.hbm %s2147_s2, %s1779_s17  ;;  %s1438_s26 = scalar_lea.hbm %s2147_s2, 512 }
  0x41   : > { %s1433_s13 = scalar_lea.hbm %s1785_s27, 256  ;;  %p1439_p3 = scmp.lt.u32.totalorder %s1785_s27, %s2147_s2 }
  0x42   : > { %p1434_p5 = scmp.ne.s32.totalorder %s1785_s27, %s1433_s13  ;;  %p1440_p7 = scmp.lt.u32.totalorder %s1438_s26, %s1433_s13 }
  0x43   : > { %p1442_p10 = scmp.lt.u32.totalorder %s1433_s13, %s1785_s27 }
  0x44   : > { %p1436_p12 = pnand %p1796_p11, %p1434_p5  ;;  %p1441_p9 = por %p1440_p7, %p1439_p3 }
  0x46   : > { %p1437_p13 = pneg %p1436_p12  ;;  %p1443_p1 = por %p1442_p10, %p1441_p9 }
  0x48   : > { %p1444_p4 = pnand %p1443_p1, %p1437_p13 }
  0x4a   : > { %1447 = shalt.err (!%p1444_p4)
}
  0x4b   : > { %s1448_s11 = scalar_lea.vmem %s1788_s9, 256  ;;  %s1630_s23 = smov [#allocation7]  }
  0x4c   : > { %p1449_p0 = scmp.ne.s32.totalorder %s1788_s9, %s1448_s11  ;;  %s1453_s25 = sshll.u32 %s1630_s23, 4  ;;  %s1454_s25 = int_to_ptr.vmem [resolvable:$false] %s1453_s25 }
  0x4d   : > { %s1455_s8 = scalar_lea.vmem %s1454_s25, 512  ;;  %p1456_p8 = scmp.lt.s32.totalorder %s1788_s9, %s1454_s25 }
  0x4e   : > { %p1451_p5 = pnand %p1449_p0, %p1796_p11  ;;  %p1457_p2 = scmp.lt.s32.totalorder %s1455_s8, %s1448_s11 }
  0x50   : > { %p1452_p12 = pneg %p1451_p5  ;;  %p1458_p3 = por %p1457_p2, %p1456_p8 }
  0x52   : > { %p1459_p7 = pnand %p1458_p3, %p1452_p12 }
  0x54   : > { %1462 = shalt.err (!%p1459_p7)
}
  0x55   : > { %s2149_s26 = smov 8   ;;  %s2150_s13 = smov 128  }
  0x56   : > { %1338 = dma.hbm_to_vmem [thread:$0]  (!%p1771_p6), %s1785_s27, 256, %s1788_s9, %s1790_s12, %s2150_s13, %s2150_s13, %s2149_s26  }
  0x57   : > { %s2151_s3 = sld [smem:[#allocation20_spill]]  ;;  %s235_s11 = scalar_lea.vmem [#allocation8], %s1776_s16 }
  0x58   : > { %s242_s8 = sshll.u32 %s235_s11, 4  ;;  %s1830_s8 = int_to_ptr.vmem [resolvable:$true] %s242_s8 }
  0x5d   : > { %s1827_s25 = scalar_lea.hbm %s2151_s3, %s1779_s17  ;;  %s1468_s9 = scalar_lea.hbm %s2151_s3, 512 }
  0x5e   : > { %s1463_s0 = scalar_lea.hbm %s1827_s25, 256  ;;  %p1469_p9 = scmp.lt.u32.totalorder %s1827_s25, %s2151_s3 }
  0x5f   : > { %p1464_p2 = scmp.ne.s32.totalorder %s1827_s25, %s1463_s0  ;;  %p1470_p10 = scmp.lt.u32.totalorder %s1468_s9, %s1463_s0 }
  0x60   : > { %p1472_p4 = scmp.lt.u32.totalorder %s1463_s0, %s1827_s25 }
  0x61   : > { %p1466_p8 = pnand %p1464_p2, %p1796_p11  ;;  %p1471_p1 = por %p1470_p10, %p1469_p9 }
  0x63   : > { %p1467_p13 = pneg %p1466_p8  ;;  %p1473_p0 = por %p1472_p4, %p1471_p1 }
  0x65   : > { %p1474_p5 = pnand %p1473_p0, %p1467_p13 }
  0x67   : > { %1477 = shalt.err (!%p1474_p5)
}
  0x68   : > { %s1478_s11 = scalar_lea.vmem %s1830_s8, 256  ;;  %s1631_s2 = smov [#allocation8]  }
  0x69   : > { %p1479_p12 = scmp.ne.s32.totalorder %s1830_s8, %s1478_s11  ;;  %s1483_s27 = sshll.u32 %s1631_s2, 4  ;;  %s1484_s27 = int_to_ptr.vmem [resolvable:$false] %s1483_s27 }
  0x6a   : > { %s1485_s28 = scalar_lea.vmem %s1484_s27, 512  ;;  %p1486_p2 = scmp.lt.s32.totalorder %s1830_s8, %s1484_s27 }
  0x6b   : > { %p1481_p3 = pnand %p1479_p12, %p1796_p11  ;;  %p1487_p8 = scmp.lt.s32.totalorder %s1485_s28, %s1478_s11 }
  0x6d   : > { %p1482_p7 = pneg %p1481_p3  ;;  %p1488_p9 = por %p1487_p8, %p1486_p2 }
  0x6f   : > { %p1489_p10 = pnand %p1488_p9, %p1482_p7 }
  0x71   : > { %1492 = shalt.err (!%p1489_p10)
}
  0x72   : > { %1341 = dma.hbm_to_vmem [thread:$0]  (!%p1771_p6), %s1827_s25, 256, %s1830_s8, %s1790_s12, %s2150_s13, %s2150_s13, %s2149_s26  }
  0x73   : > { %s1632_s0 = smov [#allocation5]   ;;  %s1861_s11 = scalar_lea.hbm %s2112_s4, %s1779_s17 }
  0x74   : > { %s196_s9 = sshll.u32 %s1632_s0, 4  ;;  %s1493_s3 = scalar_lea.hbm %s2109_s1, 256  ;;  %s197_s9 = int_to_ptr.vmem [resolvable:$true] %s196_s9 }
  0x75   : > { %p1494_p13 = scmp.ne.s32.totalorder %s2109_s1, %s1493_s3  ;;  %p2152_p1 = scmp.ne.s32.totalorder %s2142_s10, 0 }
  0x76   : > { %p1500_p12 = scmp.lt.u32.totalorder %s1493_s3, %s2109_s1 }
  0x77   : > { %p2153_p4 = pneg %p2152_p1 }
  0x79   : > { %p1496_p0 = pnand %p1494_p13, %p2153_p4 }
  0x7b   : > { %p1497_p5 = pneg %p1496_p0 }
  0x7d   : > { %p1502_p3 = pnand %p1500_p12, %p1497_p5 }
  0x7f   : > { %1505 = shalt.err (!%p1502_p3)
}
  0x80   : > { %s1506_s17 = scalar_lea.vmem %s197_s9, 256  ;;  %p2154_p2 = pmov %p2153_p4 }
  0x81   : > { %p1507_p7 = scmp.ne.s32.totalorder %s197_s9, %s1506_s17  ;;  %p1514_p10 = scmp.lt.s32.totalorder %s197_s9, %s197_s9 }
  0x82   : > { %p1515_p6 = scmp.lt.s32.totalorder %s1506_s17, %s1506_s17 }
  0x83   : > { %p1509_p8 = pnand %p1507_p7, %p2154_p2 }
  0x84   : > { %p1516_p11 = por %p1515_p6, %p1514_p10 }
  0x85   : > { %p1510_p9 = pneg %p1509_p8 }
  0x87   : > { %p1517_p4 = pnand %p1516_p11, %p1510_p9 }
  0x89   : > { %1520 = shalt.err (!%p1517_p4)
}
  0x8a   : > { %1334 = dma.hbm_to_vmem [thread:$0]  (!%p2152_p1), %s2109_s1, 256, %s197_s9, [#allocation6], %s2150_s13, %s2150_s13, %s2149_s26  }
  0x8b   : > { %s256_s24 = scalar_lea.vmem [#allocation9], %s1776_s16  ;;  %s1521_s23 = scalar_lea.hbm %s1861_s11, 256 }
  0x8c   : > { %s263_s0 = sshll.u32 %s256_s24, 4  ;;  %p1522_p6 = scmp.ne.s32.totalorder %s1861_s11, %s1521_s23  ;;  %s1887_s0 = int_to_ptr.vmem [resolvable:$true] %s263_s0 }
  0x8d   : > { %p2155_p11 = scmp.ne.s32.totalorder %s2148_s15, 0  ;;  %s1526_s27 = scalar_lea.hbm %s2112_s4, 512 }
  0x8e   : > { %p1527_p5 = scmp.lt.u32.totalorder %s1861_s11, %s2112_s4  ;;  %p1528_p12 = scmp.lt.u32.totalorder %s1526_s27, %s1521_s23 }
  0x8f   : > { %p1524_p13 = pnand %p1522_p6, %p2155_p11  ;;  %p1530_p1 = scmp.lt.u32.totalorder %s1521_s23, %s1861_s11 }
  0x90   : > { %p1529_p3 = por %p1528_p12, %p1527_p5 }
  0x91   : > { %p1525_p0 = pneg %p1524_p13 }
  0x92   : > { %p1531_p7 = por %p1530_p1, %p1529_p3 }
  0x94   : > { %p1532_p2 = pnand %p1531_p7, %p1525_p0 }
  0x96   : > { %1535 = shalt.err (!%p1532_p2)
}
  0x97   : > { %s1536_s16 = scalar_lea.vmem %s1887_s0, 256  ;;  %s1633_s9 = smov [#allocation9]  }
  0x98   : > { %p1537_p8 = scmp.ne.s32.totalorder %s1887_s0, %s1536_s16  ;;  %s1541_s8 = sshll.u32 %s1633_s9, 4  ;;  %s1542_s8 = int_to_ptr.vmem [resolvable:$false] %s1541_s8 }
  0x99   : > { %s1543_s17 = scalar_lea.vmem %s1542_s8, 512  ;;  %p1544_p4 = scmp.lt.s32.totalorder %s1887_s0, %s1542_s8 }
  0x9a   : > { %p1539_p9 = pnand %p1537_p8, %p2155_p11  ;;  %p1545_p6 = scmp.lt.s32.totalorder %s1543_s17, %s1536_s16 }
  0x9c   : > { %p1540_p10 = pneg %p1539_p9  ;;  %p1546_p13 = por %p1545_p6, %p1544_p4 }
  0x9e   : > { %p1547_p5 = pnand %p1546_p13, %p1540_p10 }
  0xa0   : > { %1550 = shalt.err (!%p1547_p5)
}
  0xa1   : > { %p2156_p0 = scmp.ne.s32.totalorder %s2146_s14, 0  ;;  %p2157_p11 = scmp.ne.s32.totalorder %s2141_s7, 0 }
  0xa2   : > { %p2158_p12 = scmp.eq.s32.totalorder (!%p2157_p11), %s1688_s22, 0 }
  0xa3   : > { %1344 = dma.hbm_to_vmem [thread:$0]  (!%p2156_p0), %s1861_s11, 256, %s1887_s0, %s1790_s12, %s2150_s13, %s2150_s13, %s2149_s26  }
  0xa4   : > { %275 = sbr.rel (%p2157_p11) target bundleno = 3608 (0xe18), region = 40 }
  0xab   : > { %1596 = dma.done.wait (%p2158_p12), [#allocation3], 256   ;;  %p2159_p3 = pmov %p2158_p12 }
  0xad   : > { %1598 = vsyncadd (%p2159_p3), [#allocation3], 4294967040  ;;  %p2160_p1 = pmov %p2159_p3 }
  0xaf   : > { %1600 = dma.done.wait (%p2160_p1), [#allocation6], 256   ;;  %p2161_p7 = pmov %p2160_p1 }
  0xb0   : > { %s285_s14 = sand.u32 1, %s1688_s22   ;;  %s287_s12 = sand.u32 1, %s1617_s19  }
  0xb1   : > { %1602 = vsyncadd (%p2161_p7), [#allocation6], 4294967040  ;;  %s1928_s7 = sshll.u32 %s287_s12, 4  ;;  %s286_s15 = scalar_lea.sflag [#allocation3], %s285_s14 }
  0xb2   : > { %s289_s26 = scalar_lea.vmem [#allocation7], %s1928_s7  ;;  %p2162_p2 = scmp.ne.s32.totalorder %s2138_s29, 0 }
  0xb4   : > { %1604 = dma.done.wait (%p2162_p2), %s286_s15, 768  }
  0xb5   : > { %1606 = vsyncadd (%p2162_p2), %s286_s15, 4294966528  ;;  %vm354_vm0 = vcmask 130048   ;;  %v348_v0 = vld [vmem:[%s289_s26] sm:$0xff]  ;;  %v349_v1 = vld [vmem:[%s289_s26 + $0x8] sm:$0xff]  ;;  %s298_s13 = scalar_lea.vmem [#allocation8], %s1928_s7  ;;  %v707_v56 = vlaneseq  ;;  %s307_s26 = scalar_lea.vmem [#allocation9], %s1928_s7 }
  0xb6   : > { %v344_v2 = vld [vmem:[#allocation2] sm:$0xff]  ;;  %v1260_v3 = vpack.c.bf16 %v349_v1, %v348_v0  ;;  %v346_v4 = vld [vmem:[#allocation5] sm:$0xff]  ;;  %v351_v6 = vld [vmem:[%s298_s13 + $0x8] sm:$0xff]  ;;  %p2163_p9 = scmp.ne.s32.totalorder %s2139_s30, 0 }
  0xb7   : > { %1229 = vmatprep.mubr.msk.f32.mxu0 %vm354_vm0, %v344_v2  ;;  %1236 = vmatprep.mubr.msk.f32.mxu1 %vm354_vm0, %v346_v4  ;;  %v350_v5 = vld [vmem:[%s298_s13] sm:$0xff]  ;;  %v345_v8 = vld [vmem:[#allocation2 + $0x8] sm:$0xff]  ;;  %v347_v9 = vld [vmem:[#allocation5 + $0x8] sm:$0xff]  ;;  %v1952_v57 = vand.u32 127, %v707_v56 }
  0xb8   : > { %1261 = vmatprep.subr.bf16.mxu0 %v1260_v3  ;;  %1265 = vmatprep.subr.bf16.mxu1 %v1260_v3  ;;  %v1268_v7 = vpack.c.bf16 %v351_v6, %v350_v5 }
  0xb9   : > { %1263 = vmatpush3.bf16.msra.mxu0 %v1260_v3  ;;  %1267 = vmatpush3.bf16.msra.mxu1 %v1260_v3 }
  0xba   : > { %1269 = vmatprep.subr.bf16.mxu0 %v1268_v7  ;;  %1273 = vmatprep.subr.bf16.mxu1 %v1268_v7 }
  0xbc   : > { %1230 = vmatmul.mubr.msk.f32.vlgmr.msra.gmra.mrb[0].mxu0 %vm354_vm0, %v345_v8  ;;  %1237 = vmatmul.mubr.msk.f32.vlgmr.msra.gmra.mrb[0].mxu1 %vm354_vm0, %v347_v9 }
  0xbd   : > { %1271 = vmatpush3.bf16.msra.mxu0 %v1268_v7  ;;  %1275 = vmatpush3.bf16.msra.mxu1 %v1268_v7 }
  0xbe   : > { %1243 = vmatprep.mubr.msk.f32.mxu0 %vm354_vm0, %v344_v2  ;;  %1250 = vmatprep.mubr.msk.f32.mxu1 %vm354_vm0, %v346_v4 }
  0xc0   : > { %1244 = vmatmul.mubr.msk.f32.vlgmr.msra.gmra.mrb[2].mxu0 %vm354_vm0, %v345_v8  ;;  %1251 = vmatmul.mubr.msk.f32.vlgmr.msra.gmra.mrb[2].mxu1 %vm354_vm0, %v347_v9 }
 0x18f   : > { %v1231_v10 = vpop.f32.mrb[0].mxu0  ;;  %v1238_v11 = vpop.f32.mrb[0].mxu1 }
 0x190   : > { %v427_v12 = vpop.f32.mrb[1].mxu0  ;;  %v508_v13 = vpop.f32.mrb[1].mxu1 }
 0x193   : > { %v1245_v14 = vpop.f32.mrb[2].mxu0  ;;  %v1252_v15 = vpop.f32.mrb[2].mxu1 }
 0x194   : > { %v668_v16 = vmul.f32 %v1245_v14, %v1231_v10  ;;  %v682_v17 = vmul.f32 %v1245_v14, %v1238_v11  ;;  %v670_v18 = vmul.f32 %v1252_v15, %v1238_v11  ;;  %v680_v19 = vmul.f32 %v1252_v15, %v1231_v10  ;;  %v583_v20 = vpop.f32.mrb[3].mxu0  ;;  %v658_v21 = vpop.f32.mrb[3].mxu1 }
 0x195   : > { %v667_v22 = vmul.f32 %v583_v20, %v427_v12  ;;  %v681_v23 = vmul.f32 %v583_v20, %v508_v13  ;;  %v669_v24 = vmul.f32 %v658_v21, %v508_v13  ;;  %v679_v25 = vmul.f32 %v658_v21, %v427_v12 }
 0x196   : > { %v684_v26 = vsub.f32 %v680_v19, %v682_v17  ;;  %v672_v27 = vadd.f32 %v670_v18, %v668_v16 }
 0x197   : > { %v683_v28 = vsub.f32 %v679_v25, %v681_v23  ;;  %v671_v29 = vadd.f32 %v669_v24, %v667_v22 }
 0x198   : > { %v688_v32 = vsel %vm354_vm0, %v684_v26, 0.0  ;;  %v676_v33 = vsel %vm354_vm0, %v672_v27, 0.0 }
 0x199   : > { %v685_v30 = vsel %vm354_vm0, %v683_v28, 0.0  ;;  %v673_v31 = vsel %vm354_vm0, %v671_v29, 0.0 }
 0x19a   : > { %686 = vadd.xlane.f32.xlu1 %v685_v30  ;;  %674 = vadd.xlane.f32.xlu0 %v673_v31 }
 0x19e   : > { %689 = vadd.xlane.f32.xlu1 %v688_v32  ;;  %677 = vadd.xlane.f32.xlu0 %v676_v33 }
 0x227   : > { %v687_v34 = vpop.xlane.xlu1 %686  ;;  %v675_v35 = vpop.xlane.xlu0 %674 }
 0x228   : > { %v693_v36 = vmul.f32 %v687_v34, %v346_v4  ;;  %v691_v37 = vmul.f32 %v675_v35, %v344_v2 }
 0x22a   : > { %v695_v40 = vsub.f32 %v691_v37, %v693_v36 }
 0x22b   : > { %v690_v38 = vpop.xlane.xlu1 %689  ;;  %v678_v39 = vpop.xlane.xlu0 %677 }
 0x22c   : > { %v694_v41 = vmul.f32 %v690_v38, %v347_v9  ;;  %v692_v42 = vmul.f32 %v678_v39, %v345_v8  ;;  %v697_v44 = vsel %vm354_vm0, %v695_v40, 0.0 }
 0x22e   : > { %v696_v43 = vsub.f32 %v692_v42, %v694_v41 }
 0x230   : > { %v698_v45 = vsel %vm354_vm0, %v696_v43, 0.0 }
 0x231   : > { %v699_v46 = vadd.f32 %v698_v45, %v697_v44 }
 0x233   : > { %v700_v47 = vrot.slane %v699_v46, 4 }
 0x235   : > { %v701_v48 = vadd.f32 %v700_v47, %v699_v46 }
 0x237   : > { %v702_v49 = vrot.slane %v701_v48, 2 }
 0x239   : > { %v703_v50 = vadd.f32 %v702_v49, %v701_v48 }
 0x23b   : > { %v704_v51 = vrot.slane %v703_v50, 1 }
 0x23d   : > { %v705_v52 = vadd.f32 %v704_v51, %v703_v50 }
 0x23f   : > { %v706_v53 = vmul.f32 0.00390625, %v705_v52 }
 0x241   : > { %v709_v54 = vsel %vm354_vm0, %v706_v53, -inf }
 0x242   : > { %710 = vmax.xlane.f32.xlu0 %v709_v54 }
 0x2cf   : > { %v711_v55 = vpop.xlane.xlu0 %710 }
 0x2d0   : > { %1280 = vpush %v711_v55 }
 0x301   : > { %s1954_s29 = spop %1280 }
 0x302   : > { %v713_v58 = vstv %s1954_s29 }
 0x303   : > { %vm714_vm1 = vcmp.eq.f32.partialorder %v706_v53, %v713_v58 }
 0x304   : > { %v715_v59 = vsel %vm714_vm1, %v1952_v57, 16 }
 0x305   : > { %v716_v60 = vsel %vm354_vm0, %v715_v59, 2147483647 }
 0x306   : > { %v718_v61 = vshra.s32 %v716_v60, 16  ;;  %v717_v63 = vand.u32 65535, %v716_v60 }
 0x308   : > { %v720_v62 = vcvt.s32.f32 %v718_v61  ;;  %v719_v1 = vcvt.s32.f32 %v717_v63 }
 0x30a   : > { %721 = vmin.xlane.f32.xlu1 %v720_v62 }
 0x397   : > { %v722_v0 = vpop.xlane.xlu1 %721 }
 0x398   : > { %vm723_vm2 = vcmp.eq.f32.partialorder %v720_v62, %v722_v0  ;;  %v728_v3 = vcvt.f32.s32 %v722_v0 }
 0x399   : > { %v724_v2 = vsel %vm723_vm2, %v719_v1, inf }
 0x39a   : > { %725 = vmin.xlane.f32.xlu0 %v724_v2  ;;  %v729_v5 = vshll.u32 %v728_v3, 16 }
 0x427   : > { %v726_v4 = vpop.xlane.xlu0 %725 }
 0x428   : > { %v727_v6 = vcvt.f32.s32 %v726_v4 }
 0x42a   : > { %v730_v7 = vadd.s32 %v729_v5, %v727_v6 }
 0x42c   : > { %1282 = vpush %v730_v7 }
 0x45d   : > { %s1283_s11 = spop %1282 }
 0x45e   : > { %v1959_v8 = vstv %s1283_s11 }
 0x45f   : > { %vm733_vm3 = vcmp.eq.s32.totalorder %v1952_v57, %v1959_v8 }
 0x460   : > { %v734_v9 = vsel %vm733_vm3, -inf, %v706_v53 }
 0x461   : > { %v735_v10 = vsel %vm354_vm0, %v734_v9, -inf }
 0x462   : > { %736 = vmax.xlane.f32.xlu1 %v735_v10 }
 0x4ef   : > { %v737_v11 = vpop.xlane.xlu1 %736 }
 0x4f0   : > { %1284 = vpush %v737_v11 }
 0x521   : > { %s1964_s3 = spop %1284 }
 0x522   : > { %v739_v12 = vstv %s1964_s3  ;;  %s836_s27 = smax.f32 %s1964_s3, %s1954_s29 }
 0x523   : > { %vm740_vm4 = vcmp.eq.f32.partialorder %v734_v9, %v739_v12 }
 0x524   : > { %v741_v13 = vsel %vm740_vm4, %v1952_v57, 16 }
 0x525   : > { %v742_v14 = vsel %vm354_vm0, %v741_v13, 2147483647 }
 0x526   : > { %v744_v15 = vshra.s32 %v742_v14, 16  ;;  %v743_v17 = vand.u32 65535, %v742_v14 }
 0x528   : > { %v746_v16 = vcvt.s32.f32 %v744_v15  ;;  %v745_v19 = vcvt.s32.f32 %v743_v17 }
 0x52a   : > { %747 = vmin.xlane.f32.xlu0 %v746_v16 }
 0x5b7   : > { %v748_v18 = vpop.xlane.xlu0 %747 }
 0x5b8   : > { %vm749_vm5 = vcmp.eq.f32.partialorder %v746_v16, %v748_v18  ;;  %v754_v21 = vcvt.f32.s32 %v748_v18 }
 0x5b9   : > { %v750_v20 = vsel %vm749_vm5, %v745_v19, inf }
 0x5ba   : > { %751 = vmin.xlane.f32.xlu1 %v750_v20  ;;  %v755_v23 = vshll.u32 %v754_v21, 16 }
 0x647   : > { %v752_v22 = vpop.xlane.xlu1 %751 }
 0x648   : > { %v753_v24 = vcvt.f32.s32 %v752_v22 }
 0x64a   : > { %v756_v25 = vadd.s32 %v755_v23, %v753_v24 }
 0x64c   : > { %1286 = vpush %v756_v25 }
 0x67d   : > { %s1287_s20 = spop %1286 }
 0x67e   : > { %v1969_v26 = vstv %s1287_s20 }
 0x67f   : > { %vm759_vm6 = vcmp.eq.s32.totalorder %v1952_v57, %v1969_v26 }
 0x680   : > { %v760_v27 = vsel %vm759_vm6, -inf, %v734_v9 }
 0x681   : > { %v761_v28 = vsel %vm354_vm0, %v760_v27, -inf }
 0x682   : > { %762 = vmax.xlane.f32.xlu0 %v761_v28 }
 0x70f   : > { %v763_v29 = vpop.xlane.xlu0 %762 }
 0x710   : > { %1288 = vpush %v763_v29 }
 0x741   : > { %s1974_s24 = spop %1288 }
 0x742   : > { %v765_v30 = vstv %s1974_s24  ;;  %s837_s28 = smax.f32 %s1974_s24, %s836_s27 }
 0x743   : > { %vm766_vm7 = vcmp.eq.f32.partialorder %v760_v27, %v765_v30 }
 0x744   : > { %v767_v31 = vsel %vm766_vm7, %v1952_v57, 16 }
 0x745   : > { %v768_v32 = vsel %vm354_vm0, %v767_v31, 2147483647 }
 0x746   : > { %v770_v33 = vshra.s32 %v768_v32, 16  ;;  %v769_v35 = vand.u32 65535, %v768_v32 }
 0x748   : > { %v772_v34 = vcvt.s32.f32 %v770_v33  ;;  %v771_v37 = vcvt.s32.f32 %v769_v35  ;;  %v352_v35 = vld [vmem:[%s307_s26] sm:$0xff] }
 0x74a   : > { %773 = vmin.xlane.f32.xlu1 %v772_v34 }
 0x7d7   : > { %v774_v36 = vpop.xlane.xlu1 %773 }
 0x7d8   : > { %vm775_vm8 = vcmp.eq.f32.partialorder %v772_v34, %v774_v36  ;;  %v780_v39 = vcvt.f32.s32 %v774_v36  ;;  %v353_v36 = vld [vmem:[%s307_s26 + $0x8] sm:$0xff] }
 0x7d9   : > { %v776_v38 = vsel %vm775_vm8, %v771_v37, inf  ;;  %v1276_v37 = vpack.c.bf16 %v353_v36, %v352_v35 }
 0x7da   : > { %777 = vmin.xlane.f32.xlu0 %v776_v38  ;;  %v781_v41 = vshll.u32 %v780_v39, 16 }
 0x7db   : > { %1277 = vmatprep.subr.bf16.mxu0 %v1276_v37 }
 0x7dc   : > { %1279 = vmatpush3.bf16.msra.mxu0 %v1276_v37 }
 0x867   : > { %v778_v40 = vpop.xlane.xlu0 %777 }
 0x868   : > { %v779_v42 = vcvt.f32.s32 %v778_v40  ;;  %v890_v40 = vshrl.u32 %v707_v56, 7 }
 0x86a   : > { %v782_v43 = vadd.s32 %v781_v41, %v779_v42  ;;  %v891_v41 = vadd.s32 8, %v890_v40  ;;  %v892_v42 = vsub.s32 %v1952_v57, %v890_v40 }
 0x86c   : > { %1290 = vpush %v782_v43  ;;  %v893_v43 = vsub.s32 %v1952_v57, %v891_v41  ;;  %vm894_vm15 = vcmp.lt.s32.totalorder %v892_v42, 0 }
 0x86e   : > { %vm895_vm1 = vcmp.lt.s32.totalorder %v893_v43, 0 }
 0x89d   : > { %s1291_s0 = spop %1290 }
 0x89e   : > { %v1979_v44 = vstv %s1291_s0 }
 0x89f   : > { %vm785_vm9 = vcmp.eq.s32.totalorder %v1952_v57, %v1979_v44 }
 0x8a0   : > { %v786_v45 = vsel %vm785_vm9, -inf, %v760_v27 }
 0x8a1   : > { %v787_v46 = vsel %vm354_vm0, %v786_v45, -inf }
 0x8a2   : > { %788 = vmax.xlane.f32.xlu1 %v787_v46  ;;  %v897_v46 = vadd.s32 16, %v893_v43 }
 0x92f   : > { %v789_v47 = vpop.xlane.xlu1 %788 }
 0x930   : > { %1292 = vpush %v789_v47 }
 0x961   : > { %s1984_s23 = spop %1292 }
 0x962   : > { %v791_v48 = vstv %s1984_s23  ;;  %s838_s25 = smax.f32 %s1984_s23, %s837_s28 }
 0x963   : > { %vm792_vm10 = vcmp.eq.f32.partialorder %v786_v45, %v791_v48  ;;  %v899_v48 = vsel %vm895_vm1, %v897_v46, %v893_v43 }
 0x964   : > { %v793_v49 = vsel %vm792_vm10, %v1952_v57, 16  ;;  %vm901_vm3 = vcmp.eq.s32.totalorder %v899_v48, %v1959_v8  ;;  %vm908_vm5 = vcmp.eq.s32.totalorder %v899_v48, %v1969_v26  ;;  %vm915_vm7 = vcmp.eq.s32.totalorder %v899_v48, %v1979_v44 }
 0x965   : > { %v794_v50 = vsel %vm354_vm0, %v793_v49, 2147483647 }
 0x966   : > { %v796_v51 = vshra.s32 %v794_v50, 16  ;;  %v795_v53 = vand.u32 65535, %v794_v50 }
 0x968   : > { %v798_v52 = vcvt.s32.f32 %v796_v51  ;;  %v797_v55 = vcvt.s32.f32 %v795_v53 }
 0x96a   : > { %799 = vmin.xlane.f32.xlu0 %v798_v52 }
 0x9f7   : > { %v800_v54 = vpop.xlane.xlu0 %799 }
 0x9f8   : > { %vm801_vm11 = vcmp.eq.f32.partialorder %v798_v52, %v800_v54  ;;  %v806_v59 = vcvt.f32.s32 %v800_v54 }
 0x9f9   : > { %v802_v58 = vsel %vm801_vm11, %v797_v55, inf }
 0x9fa   : > { %803 = vmin.xlane.f32.xlu1 %v802_v58  ;;  %v807_v61 = vshll.u32 %v806_v59, 16 }
 0xa87   : > { %v804_v60 = vpop.xlane.xlu1 %803 }
 0xa88   : > { %v805_v62 = vcvt.f32.s32 %v804_v60 }
 0xa8a   : > { %v808_v63 = vadd.s32 %v807_v61, %v805_v62 }
 0xa8c   : > { %1294 = vpush %v808_v63 }
 0xabd   : > { %s1295_s10 = spop %1294 }
 0xabe   : > { %v1989_v0 = vstv %s1295_s10 }
 0xabf   : > { %vm811_vm12 = vcmp.eq.s32.totalorder %v1952_v57, %v1989_v0  ;;  %vm922_vm9 = vcmp.eq.s32.totalorder %v899_v48, %v1989_v0 }
 0xac0   : > { %v812_v1 = vsel %vm811_vm12, -inf, %v786_v45  ;;  %v896_v45 = vadd.s32 16, %v892_v42 }
 0xac1   : > { %v813_v2 = vsel %vm354_vm0, %v812_v1, -inf }
 0xac2   : > { %814 = vmax.xlane.f32.xlu0 %v813_v2  ;;  %v898_v47 = vsel %vm894_vm15, %v896_v45, %v892_v42 }
 0xac3   : > { %vm900_vm2 = vcmp.eq.s32.totalorder %v898_v47, %v1959_v8  ;;  %vm907_vm4 = vcmp.eq.s32.totalorder %v898_v47, %v1969_v26  ;;  %vm914_vm6 = vcmp.eq.s32.totalorder %v898_v47, %v1979_v44  ;;  %vm921_vm8 = vcmp.eq.s32.totalorder %v898_v47, %v1989_v0 }
 0xb4f   : > { %v815_v3 = vpop.xlane.xlu0 %814 }
 0xb50   : > { %1296 = vpush %v815_v3 }
 0xb81   : > { %s1994_s2 = spop %1296 }
 0xb82   : > { %v817_v4 = vstv %s1994_s2  ;;  %s839_s16 = smax.f32 %s1994_s2, %s838_s25 }
 0xb83   : > { %vm818_vm13 = vcmp.eq.f32.partialorder %v812_v1, %v817_v4  ;;  %s840_s9 = ssub.f32 %s1954_s29, %s839_s16 }
 0xb84   : > { %v819_v5 = vsel %vm818_vm13, %v1952_v57, 16  ;;  %s845_s8 = ssub.f32 %s1964_s3, %s839_s16 }
 0xb85   : > { %v820_v6 = vsel %vm354_vm0, %v819_v5, 2147483647  ;;  %s850_s17 = ssub.f32 %s1974_s24, %s839_s16  ;;  %v841_v14 = vstv %s840_s9 }
 0xb86   : > { %v822_v7 = vshra.s32 %v820_v6, 16  ;;  %v821_v10 = vand.u32 65535, %v820_v6  ;;  %s855_s14 = ssub.f32 %s1984_s23, %s839_s16  ;;  %v846_v15 = vstv %s845_s8  ;;  %v842_v17 = vmul.f32 1.442695, %v841_v14 }
 0xb87   : > { %s860_s15 = ssub.f32 %s1994_s2, %s839_s16  ;;  %v851_v16 = vstv %s850_s17  ;;  %v847_v19 = vmul.f32 1.442695, %v846_v15  ;;  %s343_s17 = scalar_lea.vmem [#allocation10], %s1928_s7 }
 0xb88   : > { %v824_v9 = vcvt.s32.f32 %v822_v7  ;;  %v823_v12 = vcvt.s32.f32 %v821_v10  ;;  %v856_v18 = vstv %s855_s14  ;;  %v852_v21 = vmul.f32 1.442695, %v851_v16  ;;  %s1033_s14 = sshll.u32 %s343_s17, 4  ;;  %s2066_s7 = scalar_lea.sflag [#allocation4], %s287_s12  ;;  %s2055_s14 = int_to_ptr.vmem [resolvable:$true] %s1033_s14 }
 0xb89   : > { %v861_v20 = vstv %s860_s15  ;;  %v857_v22 = vmul.f32 1.442695, %v856_v18  ;;  %1393 = vpow2.f32 %v842_v17  ;;  %s1204_s15 = sshll.u32 %s1688_s22, 8  ;;  %s1551_s22 = scalar_lea.vmem %s2055_s14, 256 }
 0xb8a   : > { %825 = vmin.xlane.f32.xlu1 %v824_v9  ;;  %v862_v23 = vmul.f32 1.442695, %v861_v20  ;;  %1395 = vpow2.f32 %v847_v19  ;;  %p1552_p8 = scmp.ne.s32.totalorder %s2055_s14, %s1551_s22 }
 0xb8b   : > { %1397 = vpow2.f32 %v852_v21 }
 0xb8c   : > { %1399 = vpow2.f32 %v857_v22  ;;  %p1553_p10 = pnand %p1552_p8, %p2163_p9 }
 0xb8d   : > { %1401 = vpow2.f32 %v862_v23 }
 0xb8e   : > { %p1554_p4 = pneg %p1553_p10 }
 0xb93   : > { %v1394_v30 = vpop.eup %1393 }
 0xb94   : > { %v1396_v31 = vpop.eup %1395 }
 0xb95   : > { %v1398_v32 = vpop.eup %1397 }
 0xb96   : > { %v1400_v33 = vpop.eup %1399 }
 0xb97   : > { %v1402_v34 = vpop.eup %1401 }
 0xc17   : > { %v826_v11 = vpop.xlane.xlu1 %825 }
 0xc18   : > { %vm827_vm14 = vcmp.eq.f32.partialorder %v824_v9, %v826_v11  ;;  %v832_v24 = vcvt.f32.s32 %v826_v11 }
 0xc19   : > { %v828_v13 = vsel %vm827_vm14, %v823_v12, inf }
 0xc1a   : > { %829 = vmin.xlane.f32.xlu0 %v828_v13  ;;  %v833_v27 = vshll.u32 %v832_v24, 16 }
 0xca7   : > { %v830_v25 = vpop.xlane.xlu0 %829 }
 0xca8   : > { %v831_v28 = vcvt.f32.s32 %v830_v25 }
 0xcaa   : > { %v834_v29 = vadd.s32 %v833_v27, %v831_v28 }
 0xcac   : > { %1298 = vpush %v834_v29 }
 0xcad   : > { %1300 = vpush %v1394_v30 }
 0xcae   : > { %1302 = vpush %v1396_v31 }
 0xcaf   : > { %1304 = vpush %v1398_v32 }
 0xcb0   : > { %1306 = vpush %v1400_v33 }
 0xcb1   : > { %1308 = vpush %v1402_v34 }
 0xcdd   : > { %s2010_s13 = spop %1298 }
 0xcde   : > { %s2012_s29 = spop %1300  ;;  %v928_v55 = vstv %s2010_s13 }
 0xcdf   : > { %s2014_s11 = spop %1302  ;;  %vm929_vm10 = vcmp.eq.s32.totalorder %v898_v47, %v928_v55  ;;  %vm930_vm11 = vcmp.eq.s32.totalorder %v899_v48, %v928_v55 }
 0xce0   : > { %s865_s3 = sadd.f32 %s2014_s11, %s2012_s29  ;;  %s2018_s20 = spop %1304 }
 0xce1   : > { %s2021_s0 = spop %1306 }
 0xce2   : > { %s866_s24 = sadd.f32 %s2018_s20, %s865_s3  ;;  %s2024_s10 = spop %1308 }
 0xce4   : > { %s867_s23 = sadd.f32 %s2021_s0, %s866_s24 }
 0xce6   : > { %s868_s2 = sadd.f32 %s2024_s10, %s867_s23 }
 0xce8   : > { %v869_v38 = vstv %s868_s2 }
 0xce9   : > { %1403 = vrcp.f32 %v869_v38 }
 0xcf3   : > { %v1404_v39 = vpop.eup %1403 }
 0xcf4   : > { %1310 = vpush %v1404_v39 }
 0xd25   : > { %s2030_s27 = spop %1310 }
 0xd26   : > { %s872_s28 = smul.f32 %s2030_s27, %s2012_s29  ;;  %s2060_s29 = scalar_lea.hbm %s2113_s5, %s1204_s15 }
 0xd27   : > { %s876_s25 = smul.f32 %s2030_s27, %s2014_s11  ;;  %s1634_s11 = smov [#allocation10]  }
 0xd28   : > { %s880_s16 = smul.f32 %s2030_s27, %s2018_s20  ;;  %v902_v56 = vstv %s872_s28  ;;  %s1555_s3 = sshll.u32 %s1634_s11, 4  ;;  %s1556_s3 = int_to_ptr.vmem [resolvable:$false] %s1555_s3 }
 0xd29   : > { %s884_s9 = smul.f32 %s2030_s27, %s2021_s0  ;;  %v903_v57 = vsel %vm900_vm2, %v902_v56, 0.0  ;;  %v904_v49 = vsel %vm901_vm3, %v902_v56, 0.0  ;;  %v909_v50 = vstv %s876_s25  ;;  %s1557_s20 = scalar_lea.vmem %s1556_s3, 512 }
 0xd2a   : > { %s888_s8 = smul.f32 %s2030_s27, %s2024_s10  ;;  %v910_v51 = vsel %vm907_vm4, %v909_v50, 0.0  ;;  %v911_v52 = vsel %vm908_vm5, %v909_v50, 0.0  ;;  %v916_v53 = vstv %s880_s16  ;;  %p1558_p6 = scmp.lt.s32.totalorder %s2055_s14, %s1556_s3 }
 0xd2b   : > { %v912_v8 = vadd.f32 %v910_v51, %v903_v57  ;;  %v913_v54 = vadd.f32 %v911_v52, %v904_v49  ;;  %v917_v58 = vsel %vm914_vm6, %v916_v53, 0.0  ;;  %v918_v59 = vsel %vm915_vm7, %v916_v53, 0.0  ;;  %p1559_p13 = scmp.lt.s32.totalorder %s1557_s20, %s1551_s22 }
 0xd2c   : > { %v923_v26 = vstv %s884_s9  ;;  %v931_v62 = vstv %s888_s8 }
 0xd2d   : > { %v919_v60 = vadd.f32 %v917_v58, %v912_v8  ;;  %v920_v61 = vadd.f32 %v918_v59, %v913_v54  ;;  %v924_v63 = vsel %vm921_vm8, %v923_v26, 0.0  ;;  %v925_v1 = vsel %vm922_vm9, %v923_v26, 0.0  ;;  %p1560_p5 = por %p1559_p13, %p1558_p6 }
 0xd2e   : > { %v932_v3 = vsel %vm929_vm10, %v931_v62, 0.0  ;;  %v933_v4 = vsel %vm930_vm11, %v931_v62, 0.0 }
 0xd2f   : > { %v926_v44 = vadd.f32 %v924_v63, %v919_v60  ;;  %v927_v2 = vadd.f32 %v925_v1, %v920_v61  ;;  %p1561_p0 = pnand %p1560_p5, %p1554_p4 }
 0xd31   : > { %v935_v5 = vadd.f32 %v933_v4, %v927_v2  ;;  %v934_v6 = vadd.f32 %v932_v3, %v926_v44 }
 0xd33   : > { %1257 = vmatprep.mubr.msk.f32.mxu0 %vm354_vm0, %v934_v6 }
 0xd34   : > { %1258 = vmatmul.mubr.msk.f32.vlgmr.msra.gmra.mrb[4].mxu0 %vm354_vm0, %v935_v5 }
 0xe07   : > { %v1259_v0 = vpop.f32.mrb[4].mxu0 }
 0xe08   : > { %1018 = vst.msk [vmem:[%s343_s17 + $0x8] sm:$0xff] %vm354_vm0, %v1259_v0  ;;  %v1008_v7 = vpop.f32.mrb[5].mxu0 }
 0xe09   : > { %1017 = vst.msk [vmem:[%s343_s17] sm:$0xff] %vm354_vm0, %v1008_v7 }
 0xe0a   : > { %1564 = shalt.err (!%p1561_p0)
}
 0xe0b   : > { %s1565_s12 = scalar_lea.hbm %s2060_s29, 256  ;;  %s1569_s23 = scalar_lea.hbm %s2113_s5, 512 }
 0xe0c   : > { %p1566_p11 = scmp.ne.s32.totalorder %s2060_s29, %s1565_s12  ;;  %p1570_p1 = scmp.lt.u32.totalorder %s2060_s29, %s2113_s5 }
 0xe0d   : > { %p1571_p7 = scmp.lt.u32.totalorder %s1569_s23, %s1565_s12  ;;  %p1573_p8 = scmp.lt.u32.totalorder %s1565_s12, %s2060_s29 }
 0xe0e   : > { %p1567_p12 = pnand %p1566_p11, %p2163_p9 }
 0xe0f   : > { %p1572_p2 = por %p1571_p7, %p1570_p1 }
 0xe10   : > { %p1568_p3 = pneg %p1567_p12 }
 0xe11   : > { %p1574_p10 = por %p1573_p8, %p1572_p2 }
 0xe13   : > { %p1575_p4 = pnand %p1574_p10, %p1568_p3 }
 0xe15   : > { %1578 = shalt.err (!%p1575_p4)
}
 0xe16   : > { %s1635_s27 = smov 128   ;;  %s1636_s28 = smov 8  }
 0xe17   : > { %1326 = dma.vmem_to_hbm [thread:$0]  (%p2163_p9), %s2055_s14, 256, %s2060_s29, %s2066_s7, %s1635_s27, %s1635_s27, %s1636_s28  }
 0xe18 PF: > { %s1048_s25 = sand.u32 1, %s1613_s18   ;;  %p2164_p6 = scmp.ne.s32.totalorder %s2140_s6, 0 }
 0xe19   : > { %p2165_p13 = scmp.ge.s32.totalorder %s1625_s21, 2  ;;  %s1049_s16 = scalar_lea.sflag [#allocation4], %s1048_s25 }
 0xe1b   : > { %p1346_p5 = pnand %p2165_p13, %p2164_p6 }
 0xe1d   : > { %1608 = dma.done.wait (!%p1346_p5), %s1049_s16, 256  }
 0xe1e   : > { %1610 = vsyncadd (!%p1346_p5), %s1049_s16, 4294967040  ;;  %s2166_s21 = sld [smem:[#allocation16_spill]]  ;;  %s2167_s9 = sld [smem:[#allocation15_spill]] }
 0xe1f   : > { %s2168_s20 = sld [smem:[#allocation17_spill]]  ;;  %s2169_s18 = smov %s1617_s19 }
 0xe24   : > { %p17_p0 = scmp.ge.s32.totalorder %s2166_s21, 4   ;;  %s2170_s19 = smov %s2167_s9 }
 0xe26   :  { %19 = sbr.rel (!%p17_p0) target bundleno = 9 (0x9), region = 114 }
 0xe2d   :  { %1054 = vsyncpa [#allocation3], 1 }
 0xe2e   :  { %1056 = vsyncpa [#allocation3 + $0x1], 1 }
 0xe2f   :  { %1057 = vsyncpa [#allocation6], 1 }
 0xe30   :  { %1058 = vsyncpa [#allocation4], 1 }
 0xe31   :  { %1060 = vsyncpa [#allocation4 + $0x1], 1 }

</bundles_post_ra>
